<compile_context>
chip_gen: v7x
topology: tpu7x:2x2x1
jax: 0.10.0
libtpu: 0.0.40
codegen_flags: <defaults>
</compile_context>

<pallas_src>
import functools

import jax
import jax.numpy as jnp
from jax import lax
from jax.experimental import pallas as pl
from jax.experimental.pallas import tpu as pltpu

TEMPERATURE = 0.07
NEG_FILL = -9000000000000000.0  # matches torch masked_fill value
COS_EPS = 1e-8                  # F.cosine_similarity eps (clamped per-norm here)


def _info_nce_kernel(xr_ref, xp_ref, xc_ref, nll_ref, m_sc, l_sc, *, inv_temp):
    """One (row-tile, col-tile) step of the tiled InfoNCE forward.

    xr_ref : (tm, D) query rows          (block depends on grid axis 0 only)
    xp_ref : (tm, D) positive partners   (same rows, batch-rolled by N//2)
    xc_ref : (tk, D) key rows            (block depends on grid axis 1 only)
    nll_ref: (tm, 1) per-row NLL output  (written at the last column tile)
    m_sc   : (tm, 1) running row max     (VMEM scratch, persists across axis 1)
    l_sc   : (tm, 1) running row sum     (VMEM scratch, persists across axis 1)
    """
    i = pl.program_id(0)
    k = pl.program_id(1)
    num_k = pl.num_programs(1)
    tm = xr_ref.shape[0]
    tk = xc_ref.shape[0]

    @pl.when(k == 0)
    def _init():
        m_sc[...] = jnp.full_like(m_sc, -jnp.inf)
        l_sc[...] = jnp.zeros_like(l_sc)

    xr = xr_ref[...].astype(jnp.float32)            # (tm, D)
    xc = xc_ref[...].astype(jnp.float32)            # (tk, D)

    # Row L2-normalization; 1/temperature folded into the query side so the
    # MXU output is already the scaled logit (no (tm, tk) divide / 2nd pass).
    # Note: eps clamp is per-norm (vs torch's clamp of the norm product) —
    # identical except for degenerate near-zero-norm rows.
    r_norm = jnp.sqrt(jnp.sum(xr * xr, axis=-1, keepdims=True))
    c_norm = jnp.sqrt(jnp.sum(xc * xc, axis=-1, keepdims=True))
    xr_n = xr * (inv_temp / jnp.maximum(r_norm, COS_EPS))
    xc_n = xc / jnp.maximum(c_norm, COS_EPS)

    # (tm, tk) scaled cosine-similarity tile; contraction on the last dim of
    # both operands (transposed-RHS matmul) — no explicit transpose.
    logits = lax.dot_general(
        xr_n, xc_n, (((1,), (1,)), ((), ())),
        preferred_element_type=jnp.float32)

    # Self-similarity mask.  Torch fills with NEG_FILL before the /T, so the
    # fill is pre-scaled here (its exp underflows to 0 either way).
    row_g = i * tm + lax.broadcasted_iota(jnp.int32, (tm, tk), 0)
    col_g = k * tk + lax.broadcasted_iota(jnp.int32, (tm, tk), 1)
    logits = jnp.where(row_g == col_g, jnp.float32(NEG_FILL * inv_temp), logits)

    # Online (flash-style) logsumexp across column tiles.
    m_prev = m_sc[...]
    m_new = jnp.maximum(m_prev, jnp.max(logits, axis=-1, keepdims=True))
    alpha = jnp.exp(m_prev - m_new)
    l_sc[...] = alpha * l_sc[...] + jnp.sum(jnp.exp(logits - m_new),
                                            axis=-1, keepdims=True)
    m_sc[...] = m_new

    @pl.when(k == num_k - 1)
    def _finalize():
        # Positive logit: row-wise dot with the batch-rolled partner rows
        # (query side already carries the 1/temperature scale).
        xp = xp_ref[...].astype(jnp.float32)        # (tm, D)
        p_norm = jnp.sqrt(jnp.sum(xp * xp, axis=-1, keepdims=True))
        xp_n = xp / jnp.maximum(p_norm, COS_EPS)
        pos_logit = jnp.sum(xr_n * xp_n, axis=-1, keepdims=True)   # (tm, 1)
        nll_ref[...] = -pos_logit + m_sc[...] + jnp.log(l_sc[...])


def _pick_tile(n, max_tile):
    """Largest tile that divides n, is a multiple of 8 (sublanes), <= max_tile."""
    if n <= max_tile:
        return n
    t = max_tile - (max_tile % 8)
    while t >= 8:
        if n % t == 0:
            return t
        t -= 8
    return n  # no aligned divisor — fall back to a single (whole-N) tile


def info_nce_loss(feats, labels=None, temperature=TEMPERATURE,
                  *, row_tile=256, col_tile=512):
    """Pallas InfoNCE loss.  `labels` is accepted for API parity but unused
    (the reference torch forward never reads it)."""
    del labels
    n, d = feats.shape
    tm = _pick_tile(n, row_tile)
    tk = _pick_tile(n, col_tile)
    grid = (n // tm, n // tk)

    # Positive partner of row i is row (i - n//2) % n — exactly torch's
    # eye().roll(n//2, dims=0) pairing (== (i + n//2) % n for even n).
    feats_pos = jnp.roll(feats, shift=n // 2, axis=0)

    kernel = functools.partial(_info_nce_kernel,
                               inv_temp=float(1.0 / temperature))

    bytes_in = 2 * n * d * feats.dtype.itemsize
    nll_rows = pl.pallas_call(
        kernel,
        out_shape=jax.ShapeDtypeStruct((n, 1), jnp.float32),
        grid_spec=pltpu.PrefetchScalarGridSpec(
            num_scalar_prefetch=0,
            grid=grid,
            in_specs=[
                pl.BlockSpec((tm, d), lambda i, k: (i, 0)),   # query rows
                pl.BlockSpec((tm, d), lambda i, k: (i, 0)),   # rolled positives
                pl.BlockSpec((tk, d), lambda i, k: (k, 0)),   # key rows
            ],
            out_specs=pl.BlockSpec((tm, 1), lambda i, k: (i, 0)),
            scratch_shapes=[
                pltpu.VMEM((tm, 1), jnp.float32),   # running max
                pltpu.VMEM((tm, 1), jnp.float32),   # running sum
            ],
        ),
        compiler_params=pltpu.CompilerParams(
            dimension_semantics=("parallel", "arbitrary")),
        cost_estimate=pl.CostEstimate(
            flops=2 * n * n * d + 3 * n * d,
            transcendentals=n * n,
            bytes_accessed=bytes_in + n * 4),
    )(feats, feats_pos, feats)

    # Final scalar mean over the N per-row NLLs — negligible, done at XLA
    # level so the row grid axis can stay "parallel" without a write race.
    return jnp.mean(nll_rows)


def info_nce_loss_ref(feats, temperature=TEMPERATURE):
    # Pure-JAX reference mirroring the torch module, for a sanity check.
    x = feats.astype(jnp.float32)
    n = x.shape[0]
    norms = jnp.sqrt(jnp.sum(x * x, axis=-1, keepdims=True))
    cos = (x @ x.T) / jnp.maximum(norms * norms.T, COS_EPS)
    eye = jnp.eye(n, dtype=bool)
    cos = jnp.where(eye, NEG_FILL, cos) / temperature
    pos_mask = jnp.roll(eye, n // 2, axis=0)
    pos = cos[pos_mask]  # row-major order: one per row
    lse = jax.scipy.special.logsumexp(cos, axis=-1)
    return jnp.mean(-pos + lse)


if __name__ == "__main__":
    key = jax.random.PRNGKey(0)
    N, D = 8, 32  # batch of 8 views (4 positive pairs), 32-dim features
    kf, kl = jax.random.split(key)
    feats = jax.random.normal(kf, (N, D), dtype=jnp.float32)
    labels = jax.random.randint(kl, (N,), 0, 4)  # unused by the forward

    loss = info_nce_loss(feats, labels)
    jax.block_until_ready(loss)

    ref = info_nce_loss_ref(feats)
    assert jnp.allclose(loss, ref, rtol=1e-4, atol=1e-5), (loss, ref)

    print("KERNEL_OK")
</pallas_src>

<mosaic_0001>
module attributes {stable_mosaic.version = 11 : i64} {
  func.func @_info_nce_kernel(%arg0: i32, %arg1: i32, %arg2: memref<8x32xf32, #tpu.memory_space<vmem>>, %arg3: memref<8x32xf32, #tpu.memory_space<vmem>>, %arg4: memref<8x32xf32, #tpu.memory_space<vmem>>, %arg5: memref<8x1xf32, #tpu.memory_space<vmem>>, %arg6: memref<8x1xf32, #tpu.memory_space<vmem>>, %arg7: memref<8x1xf32, #tpu.memory_space<vmem>>) attributes {dimension_semantics = [#tpu.dimension_semantics<parallel>, #tpu.dimension_semantics<arbitrary>], iteration_bounds = array<i64: 1, 1>, scalar_prefetch = 0 : i64, scratch_operands = 2 : i64, tpu.core_type = #tpu.core_type<tc>, window_params = [{transform_indices = @transform_0, window_bounds = array<i64: 8, 32>}, {transform_indices = @transform_1, window_bounds = array<i64: 8, 32>}, {transform_indices = @transform_2, window_bounds = array<i64: 8, 32>}, {transform_indices = @transform_3, window_bounds = array<i64: 8, 1>}]} {
    %c0_i32 = arith.constant 0 : i32
    %0 = arith.cmpi eq, %arg1, %c0_i32 : i32
    %1 = arith.extui %0 : i1 to i32
    %c0_i32_0 = arith.constant 0 : i32
    %2 = arith.cmpi ne, %1, %c0_i32_0 : i32
    scf.if %2 {
      %cst_23 = arith.constant 0xFF800000 : f32
      %54 = vector.broadcast %cst_23 : f32 to vector<8x1xf32>
      %c0_24 = arith.constant 0 : index
      %c0_25 = arith.constant 0 : index
      %55 = vector.load %arg6[%c0_24, %c0_25] : memref<8x1xf32, #tpu.memory_space<vmem>>, vector<8x1xf32>
      tpu.vector_store %arg6[%c0_24, %c0_25], %54 {strides = array<i32>} : memref<8x1xf32, #tpu.memory_space<vmem>>, vector<8x1xf32>,
      %cst_26 = arith.constant 0.000000e+00 : f32
      %56 = vector.broadcast %cst_26 : f32 to vector<8x1xf32>
      %c0_27 = arith.constant 0 : index
      %c0_28 = arith.constant 0 : index
      %57 = vector.load %arg7[%c0_27, %c0_28] : memref<8x1xf32, #tpu.memory_space<vmem>>, vector<8x1xf32>
      tpu.vector_store %arg7[%c0_27, %c0_28], %56 {strides = array<i32>} : memref<8x1xf32, #tpu.memory_space<vmem>>, vector<8x1xf32>,
    } else {
    }
    %c0 = arith.constant 0 : index
    %c0_1 = arith.constant 0 : index
    %3 = vector.load %arg2[%c0, %c0_1] : memref<8x32xf32, #tpu.memory_space<vmem>>, vector<8x32xf32>
    %c0_2 = arith.constant 0 : index
    %c0_3 = arith.constant 0 : index
    %4 = vector.load %arg4[%c0_2, %c0_3] : memref<8x32xf32, #tpu.memory_space<vmem>>, vector<8x32xf32>
    %5 = arith.mulf %3, %3 : vector<8x32xf32>
    %cst = arith.constant dense<0.000000e+00> : vector<8xf32>
    %6 = vector.multi_reduction <add>, %5, %cst [1] : vector<8x32xf32> to vector<8xf32>
    %7 = vector.shape_cast %6 : vector<8xf32> to vector<8x1xf32>
    %8 = math.sqrt %7 : vector<8x1xf32>
    %9 = arith.mulf %4, %4 : vector<8x32xf32>
    %cst_4 = arith.constant dense<0.000000e+00> : vector<8xf32>
    %10 = vector.multi_reduction <add>, %9, %cst_4 [1] : vector<8x32xf32> to vector<8xf32>
    %11 = vector.shape_cast %10 : vector<8xf32> to vector<8x1xf32>
    %12 = math.sqrt %11 : vector<8x1xf32>
    %cst_5 = arith.constant 9.99999993E-9 : f32
    %13 = vector.broadcast %cst_5 : f32 to vector<8x1xf32>
    %14 = arith.maximumf %8, %13 : vector<8x1xf32>
    %cst_6 = arith.constant 14.2857141 : f32
    %15 = vector.broadcast %cst_6 : f32 to vector<8x1xf32>
    %16 = arith.divf %15, %14 : vector<8x1xf32>
    %17 = vector.broadcast %16 : vector<8x1xf32> to vector<8x32xf32>
    %18 = arith.mulf %3, %17 : vector<8x32xf32>
    %cst_7 = arith.constant 9.99999993E-9 : f32
    %19 = vector.broadcast %cst_7 : f32 to vector<8x1xf32>
    %20 = arith.maximumf %12, %19 : vector<8x1xf32>
    %21 = vector.broadcast %20 : vector<8x1xf32> to vector<8x32xf32>
    %22 = arith.divf %4, %21 : vector<8x32xf32>
    %cst_8 = arith.constant dense<0.000000e+00> : vector<8x8xf32>
    %23 = tpu.matmul %18, %22, %cst_8 {dimension_numbers = #tpu.dot_dimension_numbers<[1], [1], [0], [0], [0, 0, 1, 0], [], []>} : vector<8x32xf32>, vector<8x32xf32>, vector<8x8xf32> -> vector<8x8xf32>
    %c8_i32 = arith.constant 8 : i32
    %24 = arith.muli %arg0, %c8_i32 : i32
    %25 = tpu.iota {dimensions = array<i32: 0>} : vector<8x8xi32>
    %26 = vector.broadcast %24 : i32 to vector<8x8xi32>
    %27 = arith.addi %26, %25 : vector<8x8xi32>
    %c8_i32_9 = arith.constant 8 : i32
    %28 = arith.muli %arg1, %c8_i32_9 : i32
    %29 = tpu.iota {dimensions = array<i32: 1>} : vector<8x8xi32>
    %30 = vector.broadcast %28 : i32 to vector<8x8xi32>
    %31 = arith.addi %30, %29 : vector<8x8xi32>
    %32 = arith.cmpi eq, %27, %31 : vector<8x8xi32>
    %cst_10 = arith.constant -1.28571427E+17 : f32
    %33 = vector.broadcast %cst_10 : f32 to vector<8x8xf32>
    %34 = arith.select %32, %33, %23 : vector<8x8xi1>, vector<8x8xf32>
    %c0_11 = arith.constant 0 : index
    %c0_12 = arith.constant 0 : index
    %35 = vector.load %arg6[%c0_11, %c0_12] : memref<8x1xf32, #tpu.memory_space<vmem>>, vector<8x1xf32>
    %cst_13 = arith.constant dense<0xFF800000> : vector<8xf32>
    %36 = vector.multi_reduction <maximumf>, %34, %cst_13 [1] : vector<8x8xf32> to vector<8xf32>
    %37 = vector.shape_cast %36 : vector<8xf32> to vector<8x1xf32>
    %38 = arith.maximumf %35, %37 : vector<8x1xf32>
    %39 = arith.subf %35, %38 : vector<8x1xf32>
    %40 = math.exp %39 : vector<8x1xf32>
    %c0_14 = arith.constant 0 : index
    %c0_15 = arith.constant 0 : index
    %41 = vector.load %arg7[%c0_14, %c0_15] : memref<8x1xf32, #tpu.memory_space<vmem>>, vector<8x1xf32>
    %42 = arith.mulf %40, %41 : vector<8x1xf32>
    %43 = vector.broadcast %38 : vector<8x1xf32> to vector<8x8xf32>
    %44 = arith.subf %34, %43 : vector<8x8xf32>
    %45 = math.exp %44 : vector<8x8xf32>
    %cst_16 = arith.constant dense<0.000000e+00> : vector<8xf32>
    %46 = vector.multi_reduction <add>, %45, %cst_16 [1] : vector<8x8xf32> to vector<8xf32>
    %47 = vector.shape_cast %46 : vector<8xf32> to vector<8x1xf32>
    %48 = arith.addf %42, %47 : vector<8x1xf32>
    %c0_17 = arith.constant 0 : index
    %c0_18 = arith.constant 0 : index
    %49 = vector.load %arg7[%c0_17, %c0_18] : memref<8x1xf32, #tpu.memory_space<vmem>>, vector<8x1xf32>
    tpu.vector_store %arg7[%c0_17, %c0_18], %48 {strides = array<i32>} : memref<8x1xf32, #tpu.memory_space<vmem>>, vector<8x1xf32>,
    %c0_19 = arith.constant 0 : index
    %c0_20 = arith.constant 0 : index
    %50 = vector.load %arg6[%c0_19, %c0_20] : memref<8x1xf32, #tpu.memory_space<vmem>>, vector<8x1xf32>
    tpu.vector_store %arg6[%c0_19, %c0_20], %38 {strides = array<i32>} : memref<8x1xf32, #tpu.memory_space<vmem>>, vector<8x1xf32>,
    %c0_i32_21 = arith.constant 0 : i32
    %51 = arith.cmpi eq, %arg1, %c0_i32_21 : i32
    %52 = arith.extui %51 : i1 to i32
    %c0_i32_22 = arith.constant 0 : i32
    %53 = arith.cmpi ne, %52, %c0_i32_22 : i32
    scf.if %53 {
      %c0_23 = arith.constant 0 : index
      %c0_24 = arith.constant 0 : index
      %54 = vector.load %arg3[%c0_23, %c0_24] : memref<8x32xf32, #tpu.memory_space<vmem>>, vector<8x32xf32>
      %55 = arith.mulf %54, %54 : vector<8x32xf32>
      %cst_25 = arith.constant dense<0.000000e+00> : vector<8xf32>
      %56 = vector.multi_reduction <add>, %55, %cst_25 [1] : vector<8x32xf32> to vector<8xf32>
      %57 = vector.shape_cast %56 : vector<8xf32> to vector<8x1xf32>
      %58 = math.sqrt %57 : vector<8x1xf32>
      %cst_26 = arith.constant 9.99999993E-9 : f32
      %59 = vector.broadcast %cst_26 : f32 to vector<8x1xf32>
      %60 = arith.maximumf %58, %59 : vector<8x1xf32>
      %61 = vector.broadcast %60 : vector<8x1xf32> to vector<8x32xf32>
      %62 = arith.divf %54, %61 : vector<8x32xf32>
      %63 = arith.mulf %18, %62 : vector<8x32xf32>
      %cst_27 = arith.constant dense<0.000000e+00> : vector<8xf32>
      %64 = vector.multi_reduction <add>, %63, %cst_27 [1] : vector<8x32xf32> to vector<8xf32>
      %65 = vector.shape_cast %64 : vector<8xf32> to vector<8x1xf32>
      %cst_28 = arith.constant 0.000000e+00 : f32
      %66 = vector.broadcast %cst_28 : f32 to vector<8x1xf32>
      %67 = arith.subf %66, %65 : vector<8x1xf32>
      %c0_29 = arith.constant 0 : index
      %c0_30 = arith.constant 0 : index
      %68 = vector.load %arg6[%c0_29, %c0_30] : memref<8x1xf32, #tpu.memory_space<vmem>>, vector<8x1xf32>
      %69 = arith.addf %67, %68 : vector<8x1xf32>
      %c0_31 = arith.constant 0 : index
      %c0_32 = arith.constant 0 : index
      %70 = vector.load %arg7[%c0_31, %c0_32] : memref<8x1xf32, #tpu.memory_space<vmem>>, vector<8x1xf32>
      %71 = math.log %70 : vector<8x1xf32>
      %72 = arith.addf %69, %71 : vector<8x1xf32>
      %c0_33 = arith.constant 0 : index
      %c0_34 = arith.constant 0 : index
      %73 = vector.load %arg5[%c0_33, %c0_34] : memref<8x1xf32, #tpu.memory_space<vmem>>, vector<8x1xf32>
      tpu.vector_store %arg5[%c0_33, %c0_34], %72 {strides = array<i32>} : memref<8x1xf32, #tpu.memory_space<vmem>>, vector<8x1xf32>,
    } else {
    }
    return
  }
  func.func @transform_0(%arg0: i32, %arg1: i32) -> (i32, i32) {
    %c0_i32 = arith.constant 0 : i32
    %c0_i32_0 = arith.constant 0 : i32
    return %arg0, %c0_i32 : i32, i32
  }
  func.func @transform_1(%arg0: i32, %arg1: i32) -> (i32, i32) {
    %c0_i32 = arith.constant 0 : i32
    %c0_i32_0 = arith.constant 0 : i32
    return %arg0, %c0_i32 : i32, i32
  }
  func.func @transform_2(%arg0: i32, %arg1: i32) -> (i32, i32) {
    %c0_i32 = arith.constant 0 : i32
    %c0_i32_0 = arith.constant 0 : i32
    return %arg1, %c0_i32 : i32, i32
  }
  func.func @transform_3(%arg0: i32, %arg1: i32) -> (i32, i32) {
    %c0_i32 = arith.constant 0 : i32
    %c0_i32_0 = arith.constant 0 : i32
    return %arg0, %c0_i32 : i32, i32
  }
}

</mosaic_0001>

<bundles_post_ra>
// kernel: tpu_custom_call.1
= control target key start
LH: loop header
LB: loop body
LE: loop exit
PB: predicated region body
PF: predicated region fallthrough
CT: control target
= control target key end

     0   :  { %8 = vsyncpa [#allocation5], 0  ;;  %s422_s0 = inlined_call_operand.hbm [shape: f32[8,32], index: 0, kind: input, shape index: {}]   ;;  %s423_s1 = inlined_call_operand.hbm [shape: f32[8,32], index: 1, kind: input, shape index: {}]   ;;  %s424_s2 = inlined_call_operand.hbm [shape: f32[8,32], index: 2, kind: input, shape index: {}]   ;;  %s425_s3 = inlined_call_operand.vmem [shape: f32[8,1], index: 3, kind: output, shape index: {}]  }
   0x1   :  { %9 = vsyncpa [#allocation7], 0  ;;  %s343_s12 = smov [#allocation6]   ;;  %s344_s14 = smov [#allocation4]  }
   0x2   :  { %s26_s13 = sshll.u32 %s343_s12, 4  ;;  %s16_s15 = sshll.u32 %s344_s14, 4  ;;  %s27_s13 = int_to_ptr.vmem [resolvable:$true] %s26_s13  ;;  %s17_s15 = int_to_ptr.vmem [resolvable:$true] %s16_s15 }
   0x3   :  { %s273_s18 = scalar_lea.hbm %s423_s1, 128 }
   0x4   :  { %p274_p0 = scmp.ne.s32.totalorder %s423_s1, %s273_s18  ;;  %p277_p1 = scmp.lt.u32.totalorder %s273_s18, %s423_s1 }
   0x6   :  { %p279_p2 = pnand %p277_p1, %p274_p0 }
   0x8   :  { %282 = shalt.err (!%p279_p2)
}
   0x9   :  { %s283_s23 = scalar_lea.vmem %s27_s13, 128  ;;  %p288_p4 = scmp.lt.s32.totalorder %s27_s13, %s27_s13 }
   0xa   :  { %p284_p3 = scmp.ne.s32.totalorder %s27_s13, %s283_s23  ;;  %p289_p5 = scmp.lt.s32.totalorder %s283_s23, %s283_s23 }
   0xc   :  { %p290_p6 = por %p289_p5, %p288_p4 }
   0xe   :  { %p291_p7 = pnand %p290_p6, %p284_p3 }
  0x10   :  { %294 = shalt.err (!%p291_p7)
}
  0x11   :  { %29 = dma.hbm_to_vmem [thread:$0]  %s423_s1, 128, %s27_s13, [#allocation7]  }
  0x12   :  { %s295_s28 = scalar_lea.hbm %s422_s0, 128 }
  0x13   :  { %p296_p8 = scmp.ne.s32.totalorder %s422_s0, %s295_s28  ;;  %p299_p9 = scmp.lt.u32.totalorder %s295_s28, %s422_s0 }
  0x15   :  { %p301_p10 = pnand %p299_p9, %p296_p8 }
  0x17   :  { %304 = shalt.err (!%p301_p10)
}
  0x18   :  { %s305_s6 = scalar_lea.vmem %s17_s15, 128  ;;  %p310_p12 = scmp.lt.s32.totalorder %s17_s15, %s17_s15 }
  0x19   :  { %p306_p11 = scmp.ne.s32.totalorder %s17_s15, %s305_s6  ;;  %p311_p13 = scmp.lt.s32.totalorder %s305_s6, %s305_s6 }
  0x1b   :  { %p312_p0 = por %p311_p13, %p310_p12 }
  0x1d   :  { %p313_p1 = pnand %p312_p0, %p306_p11 }
  0x1f   :  { %316 = shalt.err (!%p313_p1)
}
  0x20   :  { %19 = dma.hbm_to_vmem [thread:$0]  %s422_s0, 128, %s17_s15, [#allocation5]  }
  0x21   :  { %s345_s8 = smov [#allocation8]   ;;  %s317_s12 = scalar_lea.hbm %s424_s2, 128 }
  0x22   :  { %s36_s9 = sshll.u32 %s345_s8, 4  ;;  %p318_p2 = scmp.ne.s32.totalorder %s424_s2, %s317_s12  ;;  %s37_s9 = int_to_ptr.vmem [resolvable:$true] %s36_s9 }
  0x23   :  { %p321_p3 = scmp.lt.u32.totalorder %s317_s12, %s424_s2 }
  0x25   :  { %p323_p4 = pnand %p321_p3, %p318_p2 }
  0x27   :  { %326 = shalt.err (!%p323_p4)
}
  0x28   :  { %s327_s18 = scalar_lea.vmem %s37_s9, 128  ;;  %p332_p6 = scmp.lt.s32.totalorder %s37_s9, %s37_s9 }
  0x29   :  { %p328_p5 = scmp.ne.s32.totalorder %s37_s9, %s327_s18  ;;  %p333_p7 = scmp.lt.s32.totalorder %s327_s18, %s327_s18 }
  0x2b   :  { %p334_p8 = por %p333_p7, %p332_p6 }
  0x2d   :  { %p335_p9 = pnand %p334_p8, %p328_p5 }
  0x2f   :  { %338 = shalt.err (!%p335_p9)
}
  0x30   :  { %39 = dma.hbm_to_vmem [thread:$0]  %s424_s2, 128, %s37_s9, [#allocation7]  }
  0x31   :  { %339 = dma.done.wait [#allocation5], 128  }
  0x32   :  { %340 = vsyncadd [#allocation5], 4294967168 }
  0x33   :  { %341 = dma.done.wait [#allocation7], 256  }
  0x34   :  { %342 = vsyncadd [#allocation7], 4294967040  ;;  %v57_v0 = vld [vmem:[#allocation8] sm:$0xff]  ;;  %vm59_vm0 = vcmask 261120   ;;  %v56_v1 = vld [vmem:[#allocation4] sm:$0xff]  ;;  %vm53_vm1 = vcmask 7168   ;;  %v165_v27 = vlaneseq }
  0x35   :  { %v70_v2 = vmul.f32 %v57_v0, %v57_v0  ;;  %v58_v3 = vmul.f32 %v56_v1, %v56_v1  ;;  %v346_v6 = vmov 0.0   ;;  %vm347_vm2 = vmmov 0   ;;  %v205_v30 = vld [vmem:[#allocation6] sm:$0xff] }
  0x36   :  { %55 = vst.msk [vmem:[#allocation3] sm:$0xff] %vm53_vm1, %v346_v6  ;;  %242 = vmatprep.subr.mxu0 %v346_v6  ;;  %244 = vmatprep.mubr.msk.f32.mxu0 %vm347_vm2, %v346_v6  ;;  %v348_v26 = vmov -inf   ;;  %v166_v28 = vshrl.u32 %v165_v27, 7  ;;  %v171_v29 = vand.u32 127, %v165_v27  ;;  %vm177_vm8 = vcmask 64512  }
  0x37   :  { %v71_v4 = vsel %vm59_vm0, %v70_v2, 0.0  ;;  %v60_v5 = vsel %vm59_vm0, %v58_v3, 0.0  ;;  %54 = vst.msk [vmem:[#allocation2] sm:$0xff] %vm53_vm1, %v348_v26  ;;  %v206_v32 = vmul.f32 %v205_v30, %v205_v30  ;;  %v349_v37 = vmov 0  }
  0x38   :  { %72 = vadd.xlane.f32.xlu0 %v71_v4  ;;  %vm174_vm7 = vcmp.eq.s32.totalorder %v166_v28, %v171_v29 }
  0x39   :  { %v207_v36 = vsel %vm59_vm0, %v206_v32, 0.0  ;;  %254 = vset.pattern.permute.xlu0 %v349_v37 }
  0x3c   :  { %61 = vadd.xlane.f32.xlu0 %v60_v5 }
  0x3d   :  { %v185_v60 = vld [vmem:[#allocation3] sm:$0xff] }
  0x3e   :  { %v176_v38 = vld [vmem:[#allocation2] sm:$0xff] }
  0xc5   :  { %v73_v7 = vpop.xlane.xlu0 %72 }
  0xc6   :  { %255 = vrsqrt.f32 %v73_v7  ;;  %vm76_vm3 = vcmp.eq.f32.partialorder %v73_v7, inf  ;;  %v79_v11 = vand.u32 2147483648, %v73_v7  ;;  %vm78_vm4 = vcmp.eq.f32.partialorder %v73_v7, 0.0 }
  0xc9   :  { %v62_v8 = vpop.xlane.xlu0 %61 }
  0xca   :  { %257 = vrsqrt.f32 %v62_v8  ;;  %vm65_vm5 = vcmp.eq.f32.partialorder %v62_v8, inf  ;;  %v68_v17 = vand.u32 2147483648, %v62_v8  ;;  %vm67_vm6 = vcmp.eq.f32.partialorder %v62_v8, 0.0 }
  0xd0   :  { %v256_v9 = vpop.eup %255 }
  0xd1   :  { %v75_v10 = vmul.f32 %v256_v9, %v73_v7 }
  0xd3   :  { %v77_v12 = vsel %vm76_vm3, %v73_v7, %v75_v10 }
  0xd4   :  { %v258_v13 = vpop.eup %257  ;;  %v80_v14 = vsel %vm78_vm4, %v79_v11, %v77_v12 }
  0xd5   :  { %v85_v15 = vmax.f32 %v80_v14, 1e-08  ;;  %v64_v16 = vmul.f32 %v258_v13, %v62_v8 }
  0xd7   :  { %259 = vrcp.f32 %v85_v15  ;;  %v66_v18 = vsel %vm65_vm5, %v62_v8, %v64_v16 }
  0xd8   :  { %v69_v19 = vsel %vm67_vm6, %v68_v17, %v66_v18 }
  0xd9   :  { %v81_v20 = vmax.f32 %v69_v19, 1e-08 }
  0xdb   :  { %261 = vrcp.f32 %v81_v20 }
  0xe1   :  { %v260_v21 = vpop.eup %259 }
  0xe2   :  { %v87_v22 = vmul.f32 %v260_v21, %v57_v0 }
  0xe4   :  { %243 = vmatpush3.xpose.msk.msra.mxu0 %vm59_vm0, %v87_v22 }
  0xe5   :  { %v262_v23 = vpop.eup %261 }
  0xe6   :  { %v83_v24 = vmul.f32 14.285714, %v262_v23 }
  0xe8   :  { %v84_v25 = vmul.f32 %v83_v24, %v56_v1 }
  0xea   :  { %245 = vmatmul.mubr.msk.f32.vlgmr.msra.gmra.mrb[0].mxu0 %vm59_vm0, %v84_v25 }
 0x1bd   :  { %v160_v31 = vpop.f32.mrb[0].mxu0 }
 0x1be   :  { %v175_v33 = vsel %vm174_vm7, -1.2857143e+17, %v160_v31  ;;  %v246_v34 = vpop.f32.mrb[1].mxu0 }
 0x1bf   :  { %v178_v35 = vsel %vm177_vm8, %v175_v33, -inf }
 0x1c0   :  { %179 = vmax.xlane.f32.xlu1 %v178_v35 }
 0x1c4   :  { %208 = vadd.xlane.f32.xlu1 %v207_v36 }
 0x24d   :  { %v180_v39 = vpop.xlane.xlu1 %179 }
 0x24e   :  { %v181_v40 = vmax.f32 %v176_v38, %v180_v39 }
 0x250   :  { %v182_v41 = vsub.f32 %v176_v38, %v181_v40  ;;  %201 = vst.msk [vmem:[#allocation2] sm:$0xff] %vm53_vm1, %v181_v40  ;;  %189 = vperm.xlu0 %254, %v181_v40  }
 0x251   :  { %v209_v42 = vpop.xlane.xlu1 %208 }
 0x252   :  { %263 = vrsqrt.f32 %v209_v42  ;;  %vm212_vm9 = vcmp.eq.f32.partialorder %v209_v42, inf  ;;  %v215_v45 = vand.u32 2147483648, %v209_v42  ;;  %vm214_vm10 = vcmp.eq.f32.partialorder %v209_v42, 0.0 }
 0x253   :  { %v183_v58 = vmul.f32 1.442695, %v182_v41 }
 0x257   :  { %v225_v4 = vld [vmem:[#allocation2] sm:$0xff] }
 0x25c   :  { %v264_v43 = vpop.eup %263 }
 0x25d   :  { %v211_v44 = vmul.f32 %v264_v43, %v209_v42 }
 0x25f   :  { %v213_v46 = vsel %vm212_vm9, %v209_v42, %v211_v44 }
 0x260   :  { %v216_v47 = vsel %vm214_vm10, %v215_v45, %v213_v46 }
 0x261   :  { %v217_v48 = vmax.f32 %v216_v47, 1e-08 }
 0x263   :  { %265 = vrcp.f32 %v217_v48 }
 0x26d   :  { %v266_v52 = vpop.eup %265 }
 0x26e   :  { %v219_v53 = vmul.f32 %v266_v52, %v205_v30 }
 0x270   :  { %v220_v56 = vmul.f32 %v219_v53, %v84_v25 }
 0x272   :  { %v221_v57 = vsel %vm59_vm0, %v220_v56, 0.0 }
 0x2cf   :  { %v190_v49 = vpop.permute.xlu0 %189 }
 0x2d0   :  { %v192_v50 = vsub.f32 %v175_v33, %v190_v49 }
 0x2d2   :  { %v193_v51 = vmul.f32 1.442695, %v192_v50 }
 0x2d4   :  { %267 = vpow2.f32 %v193_v51 }
 0x2d5   :  { %269 = vpow2.f32 %v183_v58 }
 0x2de   :  { %v268_v54 = vpop.eup %267 }
 0x2df   :  { %v195_v55 = vsel %vm177_vm8, %v268_v54, 0.0  ;;  %v270_v59 = vpop.eup %269 }
 0x2e0   :  { %196 = vadd.xlane.f32.xlu1 %v195_v55  ;;  %v186_v61 = vmul.f32 %v270_v59, %v185_v60 }
 0x2e4   :  { %222 = vadd.xlane.f32.xlu1 %v221_v57 }
 0x36d   :  { %v197_v62 = vpop.xlane.xlu1 %196 }
 0x36e   :  { %v198_v63 = vadd.f32 %v197_v62, %v186_v61 }
 0x370   :  { %200 = vst.msk [vmem:[#allocation3] sm:$0xff] %vm53_vm1, %v198_v63 }
 0x371   :  { %v223_v1 = vpop.xlane.xlu1 %222 }
 0x372   :  { %v224_v2 = vsub.f32 0.0, %v223_v1 }
 0x374   :  { %v226_v5 = vadd.f32 %v225_v4, %v224_v2 }
 0x377   :  { %v227_v0 = vld [vmem:[#allocation3] sm:$0xff] }
 0x378   :  { %271 = vlog2.f32 %v227_v0 }
 0x382   :  { %v272_v3 = vpop.eup %271 }
 0x383   :  { %v229_v6 = vmul.f32 0.6931472, %v272_v3 }
 0x385   :  { %v230_v7 = vadd.f32 %v229_v6, %v226_v5 }
 0x387   :  { %231 = vst.msk [vmem:[%s425_s3] sm:$0xff] %vm53_vm1, %v230_v7 }
 0x388   :  { %236 = vsyncpa [#allocation5], 1 }
 0x389   :  { %237 = vsyncpa [#allocation7], 1 }

</bundles_post_ra>
